<compile_context>
chip_gen: v6e
topology: v6e:2x2x1
jax: 0.10.0
libtpu: 0.0.40
codegen_flags: <defaults>
</compile_context>

<pallas_src>
import functools

import jax
import jax.numpy as jnp
from jax.experimental import pallas as pl
from jax.experimental.pallas import tpu as pltpu

HIDDEN = 24
LANE = 128  # batch-tile granularity (lane width); all tiles are multiples of this


def _round_up(n, m):
    return ((n + m - 1) // m) * m


def critic_kernel(x_ref, w1_ref, b1_ref, w2_ref, b2_ref, w3_ref, b3_ref, o_ref):
    # x_ref: (state_size, TILE_B) in compute dtype; weights (out, in) in
    # compute dtype; biases (out, 1) f32; output (1, TILE_B) f32.
    x = x_ref[...]
    # fc1 + ReLU -> (24, TILE_B); f32 accumulate, back to compute dtype for MXU
    h = jnp.dot(w1_ref[...], x, preferred_element_type=jnp.float32) + b1_ref[...]
    h = jnp.maximum(h, 0.0).astype(x.dtype)
    # fc2 + ReLU -> (24, TILE_B)
    h = jnp.dot(w2_ref[...], h, preferred_element_type=jnp.float32) + b2_ref[...]
    h = jnp.maximum(h, 0.0).astype(x.dtype)
    # fc3 -> (1, TILE_B)  (lane-dense store)
    o_ref[...] = (
        jnp.dot(w3_ref[...], h, preferred_element_type=jnp.float32) + b3_ref[...]
    ).astype(o_ref.dtype)


@functools.partial(
    jax.jit,
    static_argnames=("tile_b", "min_steps", "compute_dtype", "vmem_limit_bytes"),
)
def critic_forward_t(xt, params, *, tile_b=16384, min_steps=2,
                     compute_dtype=jnp.bfloat16, vmem_limit_bytes=None):
    """Fast path. xt: (state_size, B) float (batch-minor). Returns (1, B) f32."""
    S, B = xt.shape

    # --- batch-tile selection (always a multiple of 128 lanes) -------------
    tile_b = max(LANE, _round_up(int(tile_b), LANE))        # alignment guard
    tile_b = min(tile_b, _round_up(B, LANE))                # clamp for small B
    if min_steps > 1:                                       # v7x: feed both TCs
        tile_b = min(tile_b, max(LANE, _round_up(pl.cdiv(B, min_steps), LANE)))
    Bp = _round_up(B, tile_b)
    grid = (Bp // tile_b,)

    # --- operand prep -------------------------------------------------------
    # cast + (only-if-ragged) pad fuse into one tiny pass over x; if the
    # producer already supplies bf16, lane-aligned x this is a no-op.
    xt = xt.astype(compute_dtype)
    if Bp != B:
        xt = jnp.pad(xt, ((0, 0), (0, Bp - B)))
    w1 = params["w1"].astype(compute_dtype)
    w2 = params["w2"].astype(compute_dtype)
    w3 = params["w3"].astype(compute_dtype)
    b1 = params["b1"].astype(jnp.float32)
    b2 = params["b2"].astype(jnp.float32)
    b3 = params["b3"].astype(jnp.float32)

    const = lambda i: (0, 0)  # same block every step -> stays VMEM-resident

    out = pl.pallas_call(
        critic_kernel,
        out_shape=jax.ShapeDtypeStruct((1, Bp), jnp.float32),
        grid=grid,
        in_specs=[
            pl.BlockSpec((S, tile_b), lambda i: (0, i)),   # x tile: streamed/pipelined
            pl.BlockSpec((HIDDEN, S), const),              # w1
            pl.BlockSpec((HIDDEN, 1), const),              # b1
            pl.BlockSpec((HIDDEN, HIDDEN), const),         # w2
            pl.BlockSpec((HIDDEN, 1), const),              # b2
            pl.BlockSpec((1, HIDDEN), const),              # w3
            pl.BlockSpec((1, 1), const),                   # b3
        ],
        out_specs=pl.BlockSpec((1, tile_b), lambda i: (0, i)),
        compiler_params=pltpu.CompilerParams(
            dimension_semantics=("parallel",),   # v7x: shard batch tiles across 2 TCs
            vmem_limit_bytes=vmem_limit_bytes,   # only needed for 32K+ tiles on v5e
        ),
    )(xt, w1, b1, w2, b2, w3, b3)

    return out[:, :B]  # (1, B) float32


@functools.partial(
    jax.jit,
    static_argnames=("tile_b", "min_steps", "compute_dtype", "vmem_limit_bytes"),
)
def critic_forward(x, params, *, tile_b=16384, min_steps=2,
                   compute_dtype=jnp.bfloat16, vmem_limit_bytes=None):
    """Compatibility wrapper. x: (B, state_size) (PyTorch layout). Returns (B, 1) f32."""
    out_t = critic_forward_t(
        jnp.transpose(x), params, tile_b=tile_b, min_steps=min_steps,
        compute_dtype=compute_dtype, vmem_limit_bytes=vmem_limit_bytes)
    return jnp.transpose(out_t)


def init_critic_params(key, state_size, hidden=HIDDEN):
    """Deterministic init mimicking PyTorch nn.Linear (uniform +/- 1/sqrt(fan_in)).
    Weights are stored in PyTorch (out, in) layout; biases as (out, 1) columns."""
    k1, k2, k3, k4, k5, k6 = jax.random.split(key, 6)

    def uinit(k, shape, fan_in):
        bound = 1.0 / jnp.sqrt(jnp.float32(fan_in))
        return jax.random.uniform(k, shape, jnp.float32, -bound, bound)

    return {
        "w1": uinit(k1, (hidden, state_size), state_size),
        "b1": uinit(k2, (hidden, 1), state_size),
        "w2": uinit(k3, (hidden, hidden), hidden),
        "b2": uinit(k4, (hidden, 1), hidden),
        "w3": uinit(k5, (1, hidden), hidden),
        "b3": uinit(k6, (1, 1), hidden),
    }


def critic_ref(x, params):
    """Pure-JAX f32 reference (identical math to the PyTorch module)."""
    h1 = jnp.maximum(x @ params["w1"].T + params["b1"].T, 0.0)
    h2 = jnp.maximum(h1 @ params["w2"].T + params["b2"].T, 0.0)
    return h2 @ params["w3"].T + params["b3"].T


if __name__ == "__main__":
    key = jax.random.PRNGKey(0)
    k_x, k_x2, k_p = jax.random.split(key, 3)

    state_size = 4  # CartPole observation dimension
    params = init_critic_params(k_p, state_size)

    # (1) Tiny CartPole batch, exact f32 path -> matches PyTorch math to 1e-5.
    x_small = jax.random.normal(k_x, (8, state_size), dtype=jnp.float32)
    out_small = jax.block_until_ready(
        critic_forward(x_small, params, compute_dtype=jnp.float32))
    ref_small = critic_ref(x_small, params)
    assert out_small.shape == (8, 1)
    assert jnp.allclose(out_small, ref_small, atol=1e-5, rtol=1e-5), "mismatch (B=8, f32)"

    # (2) Ragged batch via the batch-minor fast path (no wrapper transpose),
    #     default bf16 compute, multi-step grid + tail padding exercised.
    B = 1000
    x_big = jax.random.normal(k_x2, (B, state_size), dtype=jnp.float32)
    ref_big = critic_ref(x_big, params)

    xt_big = x_big.T  # producer emits (state_size, B)
    out_t = jax.block_until_ready(critic_forward_t(xt_big, params))
    assert out_t.shape == (1, B)
    assert jnp.allclose(out_t.T, ref_big, atol=5e-2, rtol=5e-2), "mismatch (B=1000, bf16, batch-minor)"

    # (3) Row-major compatibility wrapper, bf16 default.
    out_big = jax.block_until_ready(critic_forward(x_big, params))
    assert out_big.shape == (B, 1)
    assert jnp.allclose(out_big, ref_big, atol=5e-2, rtol=5e-2), "mismatch (B=1000, bf16)"

    print("KERNEL_OK")
</pallas_src>

<mosaic_0001>
module attributes {stable_mosaic.version = 11 : i64} {
  func.func @critic_kernel(%arg0: i32, %arg1: memref<4x128xf32, #tpu.memory_space<vmem>>, %arg2: memref<24x4xf32, #tpu.memory_space<vmem>>, %arg3: memref<24x1xf32, #tpu.memory_space<vmem>>, %arg4: memref<24x24xf32, #tpu.memory_space<vmem>>, %arg5: memref<24x1xf32, #tpu.memory_space<vmem>>, %arg6: memref<1x24xf32, #tpu.memory_space<vmem>>, %arg7: memref<1x1xf32, #tpu.memory_space<vmem>>, %arg8: memref<1x128xf32, #tpu.memory_space<vmem>>) attributes {dimension_semantics = [#tpu.dimension_semantics<parallel>], iteration_bounds = array<i64: 1>, scalar_prefetch = 0 : i64, scratch_operands = 0 : i64, tpu.core_type = #tpu.core_type<tc>, window_params = [{transform_indices = @transform_0, window_bounds = array<i64: 4, 128>}, {pipeline_mode = #tpu.pipeline_mode<synchronous>, transform_indices = @transform_1, window_bounds = array<i64: 24, 4>}, {pipeline_mode = #tpu.pipeline_mode<synchronous>, transform_indices = @transform_2, window_bounds = array<i64: 24, 1>}, {pipeline_mode = #tpu.pipeline_mode<synchronous>, transform_indices = @transform_3, window_bounds = array<i64: 24, 24>}, {pipeline_mode = #tpu.pipeline_mode<synchronous>, transform_indices = @transform_4, window_bounds = array<i64: 24, 1>}, {pipeline_mode = #tpu.pipeline_mode<synchronous>, transform_indices = @transform_5, window_bounds = array<i64: 1, 24>}, {pipeline_mode = #tpu.pipeline_mode<synchronous>, transform_indices = @transform_6, window_bounds = array<i64: 1, 1>}, {transform_indices = @transform_7, window_bounds = array<i64: 1, 128>}]} {
    %c0 = arith.constant 0 : index
    %c0_0 = arith.constant 0 : index
    %0 = vector.load %arg1[%c0, %c0_0] : memref<4x128xf32, #tpu.memory_space<vmem>>, vector<4x128xf32>
    %c0_1 = arith.constant 0 : index
    %c0_2 = arith.constant 0 : index
    %1 = vector.load %arg2[%c0_1, %c0_2] : memref<24x4xf32, #tpu.memory_space<vmem>>, vector<24x4xf32>
    %cst = arith.constant dense<0.000000e+00> : vector<24x128xf32>
    %2 = tpu.matmul %1, %0, %cst {dimension_numbers = #tpu.dot_dimension_numbers<[1], [0], [0], [1], [0, 0, 1, 1], [], []>} : vector<24x4xf32>, vector<4x128xf32>, vector<24x128xf32> -> vector<24x128xf32>
    %c0_3 = arith.constant 0 : index
    %c0_4 = arith.constant 0 : index
    %3 = vector.load %arg3[%c0_3, %c0_4] : memref<24x1xf32, #tpu.memory_space<vmem>>, vector<24x1xf32>
    %4 = vector.broadcast %3 : vector<24x1xf32> to vector<24x128xf32>
    %5 = arith.addf %2, %4 : vector<24x128xf32>
    %cst_5 = arith.constant 0.000000e+00 : f32
    %6 = vector.broadcast %cst_5 : f32 to vector<24x128xf32>
    %7 = arith.maximumf %5, %6 : vector<24x128xf32>
    %c0_6 = arith.constant 0 : index
    %c0_7 = arith.constant 0 : index
    %8 = vector.load %arg4[%c0_6, %c0_7] : memref<24x24xf32, #tpu.memory_space<vmem>>, vector<24x24xf32>
    %cst_8 = arith.constant dense<0.000000e+00> : vector<24x128xf32>
    %9 = tpu.matmul %8, %7, %cst_8 {dimension_numbers = #tpu.dot_dimension_numbers<[1], [0], [0], [1], [0, 0, 1, 1], [], []>} : vector<24x24xf32>, vector<24x128xf32>, vector<24x128xf32> -> vector<24x128xf32>
    %c0_9 = arith.constant 0 : index
    %c0_10 = arith.constant 0 : index
    %10 = vector.load %arg5[%c0_9, %c0_10] : memref<24x1xf32, #tpu.memory_space<vmem>>, vector<24x1xf32>
    %11 = vector.broadcast %10 : vector<24x1xf32> to vector<24x128xf32>
    %12 = arith.addf %9, %11 : vector<24x128xf32>
    %cst_11 = arith.constant 0.000000e+00 : f32
    %13 = vector.broadcast %cst_11 : f32 to vector<24x128xf32>
    %14 = arith.maximumf %12, %13 : vector<24x128xf32>
    %c0_12 = arith.constant 0 : index
    %c0_13 = arith.constant 0 : index
    %15 = vector.load %arg6[%c0_12, %c0_13] : memref<1x24xf32, #tpu.memory_space<vmem>>, vector<1x24xf32>
    %cst_14 = arith.constant dense<0.000000e+00> : vector<1x128xf32>
    %16 = tpu.matmul %15, %14, %cst_14 {dimension_numbers = #tpu.dot_dimension_numbers<[1], [0], [0], [1], [0, 0, 1, 1], [], []>} : vector<1x24xf32>, vector<24x128xf32>, vector<1x128xf32> -> vector<1x128xf32>
    %c0_15 = arith.constant 0 : index
    %c0_16 = arith.constant 0 : index
    %17 = vector.load %arg7[%c0_15, %c0_16] : memref<1x1xf32, #tpu.memory_space<vmem>>, vector<1x1xf32>
    %18 = vector.broadcast %17 : vector<1x1xf32> to vector<1x128xf32>
    %19 = arith.addf %16, %18 : vector<1x128xf32>
    %c0_17 = arith.constant 0 : index
    %c0_18 = arith.constant 0 : index
    %20 = vector.load %arg8[%c0_17, %c0_18] : memref<1x128xf32, #tpu.memory_space<vmem>>, vector<1x128xf32>
    tpu.vector_store %arg8[%c0_17, %c0_18], %19 {strides = array<i32>} : memref<1x128xf32, #tpu.memory_space<vmem>>, vector<1x128xf32>,
    return
  }
  func.func @transform_0(%arg0: i32) -> (i32, i32) {
    %c0_i32 = arith.constant 0 : i32
    %c0_i32_0 = arith.constant 0 : i32
    return %c0_i32, %arg0 : i32, i32
  }
  func.func @transform_1(%arg0: i32) -> (i32, i32) {
    %c0_i32 = arith.constant 0 : i32
    %c0_i32_0 = arith.constant 0 : i32
    %c0_i32_1 = arith.constant 0 : i32
    return %c0_i32, %c0_i32_0 : i32, i32
  }
  func.func @transform_2(%arg0: i32) -> (i32, i32) {
    %c0_i32 = arith.constant 0 : i32
    %c0_i32_0 = arith.constant 0 : i32
    %c0_i32_1 = arith.constant 0 : i32
    return %c0_i32, %c0_i32_0 : i32, i32
  }
  func.func @transform_3(%arg0: i32) -> (i32, i32) {
    %c0_i32 = arith.constant 0 : i32
    %c0_i32_0 = arith.constant 0 : i32
    %c0_i32_1 = arith.constant 0 : i32
    return %c0_i32, %c0_i32_0 : i32, i32
  }
  func.func @transform_4(%arg0: i32) -> (i32, i32) {
    %c0_i32 = arith.constant 0 : i32
    %c0_i32_0 = arith.constant 0 : i32
    %c0_i32_1 = arith.constant 0 : i32
    return %c0_i32, %c0_i32_0 : i32, i32
  }
  func.func @transform_5(%arg0: i32) -> (i32, i32) {
    %c0_i32 = arith.constant 0 : i32
    %c0_i32_0 = arith.constant 0 : i32
    %c0_i32_1 = arith.constant 0 : i32
    return %c0_i32, %c0_i32_0 : i32, i32
  }
  func.func @transform_6(%arg0: i32) -> (i32, i32) {
    %c0_i32 = arith.constant 0 : i32
    %c0_i32_0 = arith.constant 0 : i32
    %c0_i32_1 = arith.constant 0 : i32
    return %c0_i32, %c0_i32_0 : i32, i32
  }
  func.func @transform_7(%arg0: i32) -> (i32, i32) {
    %c0_i32 = arith.constant 0 : i32
    %c0_i32_0 = arith.constant 0 : i32
    return %c0_i32, %arg0 : i32, i32
  }
}

</mosaic_0001>

<bundles_post_ra>
// kernel: critic_forward_t.1
= control target key start
LH: loop header
LB: loop body
LE: loop exit
PB: predicated region body
PF: predicated region fallthrough
CT: control target
= control target key end

     0   :  { %s566_s0 = inlined_call_operand.vmem [shape: f32[4,128], index: 0, kind: input, shape index: {}]   ;;  %s567_s1 = inlined_call_operand.vmem [shape: f32[24,4], index: 1, kind: input, shape index: {}]   ;;  %s568_s2 = inlined_call_operand.vmem [shape: f32[24,1], index: 2, kind: input, shape index: {}]   ;;  %s569_s3 = inlined_call_operand.vmem [shape: f32[24,24], index: 3, kind: input, shape index: {}]   ;;  %s570_s4 = inlined_call_operand.vmem [shape: f32[24,1], index: 4, kind: input, shape index: {}]   ;;  %s571_s5 = inlined_call_operand.vmem [shape: f32[1,24], index: 5, kind: input, shape index: {}]   ;;  %s572_s6 = inlined_call_operand.<no memory space> [shape: f32[1,1], index: 6, kind: input, shape index: {}]   ;;  %s573_s7 = inlined_call_operand.hbm [shape: f32[1,128], index: 7, kind: output, shape index: {}]  }
   0x1   :  { %v12_v0 = vstv %s572_s6 }
   0x2   :  { %13 = vst [vmem:[#allocation2] sm:$0x1] %v12_v0 }
   0x3   :  { %v29_v1 = vld [vmem:[%s566_s0] sm:$0xf]  ;;  %vm61_vm0 = vcmask 1043456   ;;  %v446_v3 = vmov 0.0   ;;  %vm447_vm1 = vmmov 0   ;;  %vm51_vm2 = vcmask 31744  }
   0x4   :  { %v30_v2 = vld [vmem:[%s567_s1] sm:$0xff]  ;;  %383 = vmatprep.subr.mxu0 %v446_v3  ;;  %385 = vmatprep.mubr.msk.f32.mxu0 %vm447_vm1, %v446_v3  ;;  %v35_v4 = vld [vmem:[%s568_s2 + $0x10] sm:$0xff]  ;;  %v448_v5 = vmov 0   ;;  %v31_v7 = vld [vmem:[%s567_s1 + $0x8] sm:$0xff] }
   0x5   :  { %384 = vmatpush3.msk.msra.mxu0 %vm61_vm0, %v29_v1  ;;  %422 = vset.pattern.permute.xlu0 %v448_v5  ;;  %v33_v6 = vld [vmem:[%s568_s2] sm:$0xff]  ;;  %v34_v8 = vld [vmem:[%s568_s2 + $0x8] sm:$0xff] }
   0x6   :  { %386 = vmatmul.mubr.msk.f32.vlgmr.msra.gmra.mxu0 %vm51_vm2, %v30_v2  ;;  %48 = vperm.xlu0 %422, %v35_v4  }
   0x7   :  { %388 = vmatprep.mubr.msk.f32.mxu0 %vm447_vm1, %v446_v3  ;;  %423 = vset.pattern.permute.xlu1 %v448_v5 }
   0x8   :  { %14 = vsyncpa [#allocation4], 0  ;;  %38 = vperm.xlu1 %423, %v33_v6   ;;  %394 = vmatprep.subr.mxu1 %v446_v3  ;;  %v153_v9 = vld [vmem:[%s570_s4 + $0x10] sm:$0xff]  ;;  %v152_v11 = vld [vmem:[%s570_s4 + $0x8] sm:$0xff]  ;;  %vm169_vm3 = vcmask 195584   ;;  %v269_v48 = vlaneseq  ;;  %s449_s25 = smov [#allocation3]  }
   0x9   :  { %400 = vmatprep.mubr.msk.f32.mxu1 %vm447_vm1, %v446_v3  ;;  %409 = vmatprep.subr.mxu0 %v446_v3  ;;  %v32_v10 = vld [vmem:[%s567_s1 + $0x10] sm:$0xff]  ;;  %v151_v12 = vld [vmem:[%s570_s4] sm:$0xff]  ;;  %v149_v30 = vld [vmem:[%s569_s3 + $0x8] sm:$0xff]  ;;  %s353_s26 = sshll.u32 %s449_s25, 4  ;;  %s354_s26 = int_to_ptr.vmem [resolvable:$true] %s353_s26 }
   0xa   :  { %389 = vmatmul.mubr.msk.f32.gmra.mxu0 %vm51_vm2, %v31_v7  ;;  %43 = vperm.xlu0 %422, %v34_v8   ;;  %v263_v13 = vld [vmem:[#allocation2] sm:$0x1]  ;;  %v150_v31 = vld [vmem:[%s569_s3 + $0x10] sm:$0xff]  ;;  %v270_v49 = vshrl.u32 %v269_v48, 7  ;;  %s424_s27 = scalar_lea.vmem %s354_s26, 16  ;;  %p429_p1 = scmp.lt.s32.totalorder %s354_s26, %s354_s26 }
   0xb   :  { %391 = vmatprep.mubr.msk.f32.mxu0 %vm447_vm1, %v446_v3  ;;  %v148_v29 = vld [vmem:[%s569_s3] sm:$0xff]  ;;  %p425_p0 = scmp.ne.s32.totalorder %s354_s26, %s424_s27 }
   0xc   :  { %166 = vperm.xlu1 %423, %v153_v9   ;;  %v262_v47 = vld [vmem:[%s571_s5] sm:$0x1]  ;;  %v271_v50 = vsub.s32 0, %v270_v49  ;;  %s428_s5 = scalar_lea.vmem %s354_s26, 32 }
   0xd   :  { %p430_p2 = scmp.lt.s32.totalorder %s428_s5, %s424_s27 }
   0xe   :  { %392 = vmatmul.mubr.msk.f32.gmra.mxu0 %vm51_vm2, %v32_v10  ;;  %161 = vperm.xlu0 %422, %v152_v11  }
   0xf   :  { %415 = vmatprep.mubr.msk.f32.mxu0 %vm447_vm1, %v446_v3  ;;  %p431_p3 = por %p430_p2, %p429_p1 }
  0x10   :  { %156 = vperm.xlu1 %423, %v151_v12  }
  0x11   :  { %p432_p4 = pnand %p431_p3, %p425_p0 }
  0x12   :  { %266 = vperm.xlu0 %422, %v263_v13  }
  0x81   :  { %v49_v15 = vpop.permute.xlu0 %48 }
  0x83   :  { %v39_v19 = vpop.permute.xlu1 %38 }
  0x85   :  { %v44_v20 = vpop.permute.xlu0 %43 }
  0x87   :  { %v167_v34 = vpop.permute.xlu1 %166 }
  0x89   :  { %v162_v37 = vpop.permute.xlu0 %161 }
  0x8b   :  { %v157_v41 = vpop.permute.xlu1 %156 }
  0x8d   :  { %v267_v51 = vpop.permute.xlu0 %266 }
  0x8e   :  { %v272_v52 = vrot.slane %v267_v51, %v271_v50 }
  0xc6   :  { %v131_v14 = vpop.f32.mrf.mxu0 }
  0xc7   :  { %v132_v25 = vadd.f32 %v131_v14, %v39_v19 }
  0xc8   :  { %v387_v16 = vpop.f32.mrf.mxu0 }
  0xc9   :  { %v145_v28 = vmax.f32 %v132_v25, 0.0 }
  0xca   :  { %v136_v17 = vpop.f32.mrf.mxu0 }
  0xcb   :  { %v137_v22 = vadd.f32 %v136_v17, %v44_v20 }
  0xcc   :  { %v390_v18 = vpop.f32.mrf.mxu0 }
  0xcd   :  { %v146_v27 = vmax.f32 %v137_v22, 0.0 }
  0xce   :  { %v141_v21 = vpop.f32.mrf.mxu0 }
  0xcf   :  { %v142_v23 = vadd.f32 %v141_v21, %v49_v15 }
  0xd0   :  { %v393_v24 = vpop.f32.mrf.mxu0 }
  0xd1   :  { %v147_v26 = vmax.f32 %v142_v23, 0.0 }
  0xd3   :  { %395 = vmatpush3.msra.mxu1 %v147_v26 }
  0xd4   :  { %396 = vmatprep.subr.mxu1 %v446_v3 }
  0xd5   :  { %397 = vmatpush3.msra.mxu1 %v146_v27 }
  0xd6   :  { %398 = vmatprep.subr.mxu1 %v446_v3 }
  0xd7   :  { %399 = vmatpush3.msra.mxu1 %v145_v28 }
  0xd8   :  { %401 = vmatmul.mubr.msk.f32.vlgmr.msra.gmra.mxu1 %vm169_vm3, %v148_v29 }
  0xd9   :  { %403 = vmatprep.mubr.msk.f32.mxu1 %vm447_vm1, %v446_v3 }
  0xdc   :  { %404 = vmatmul.mubr.msk.f32.gmra.mxu1 %vm169_vm3, %v149_v30 }
  0xdd   :  { %406 = vmatprep.mubr.msk.f32.mxu1 %vm447_vm1, %v446_v3 }
  0xe0   :  { %407 = vmatmul.mubr.msk.f32.gmra.mxu1 %vm169_vm3, %v150_v31 }
 0x198   :  { %v245_v32 = vpop.f32.mrf.mxu1 }
 0x199   :  { %v246_v43 = vadd.f32 %v245_v32, %v157_v41 }
 0x19a   :  { %v402_v33 = vpop.f32.mrf.mxu1 }
 0x19b   :  { %v259_v46 = vmax.f32 %v246_v43, 0.0 }
 0x19c   :  { %v250_v35 = vpop.f32.mrf.mxu1 }
 0x19d   :  { %v251_v39 = vadd.f32 %v250_v35, %v162_v37 }
 0x19e   :  { %v405_v36 = vpop.f32.mrf.mxu1 }
 0x19f   :  { %v260_v45 = vmax.f32 %v251_v39, 0.0 }
 0x1a0   :  { %v255_v38 = vpop.f32.mrf.mxu1 }
 0x1a1   :  { %v256_v40 = vadd.f32 %v255_v38, %v167_v34 }
 0x1a2   :  { %v408_v42 = vpop.f32.mrf.mxu1 }
 0x1a3   :  { %v261_v44 = vmax.f32 %v256_v40, 0.0 }
 0x1a5   :  { %410 = vmatpush3.msra.mxu0 %v261_v44 }
 0x1a6   :  { %411 = vmatprep.subr.mxu0 %v446_v3 }
 0x1a7   :  { %412 = vmatpush3.msra.mxu0 %v260_v45 }
 0x1a8   :  { %413 = vmatprep.subr.mxu0 %v446_v3 }
 0x1a9   :  { %414 = vmatpush3.msra.mxu0 %v259_v46 }
 0x1aa   :  { %416 = vmatmul.mubr.msk.f32.vlgmr.msra.gmra.mxu0 %vm169_vm3, %v262_v47 }
 0x26a   :  { %v342_v53 = vpop.f32.mrf.mxu0 }
 0x26b   :  { %v343_v54 = vadd.f32 %v342_v53, %v272_v52 }
 0x26c   :  { %v417_v55 = vpop.f32.mrf.mxu0 }
 0x26d   :  { %346 = vst [vmem:[#allocation3] sm:$0x1] %v343_v54 }
 0x26e   :  { %435 = shalt.err (!%p432_p4)
}
 0x26f   :  { %356 = dma.vmem_to_hbm [thread:$0]  %s354_s26, 16, %s573_s7, [#allocation4]  }
 0x270   :  { %444 = dma.done.wait [#allocation4], 16  }
 0x271   :  { %445 = vsyncadd [#allocation4], 4294967280 }
 0x272   :  { %360 = vsyncpa [#allocation4], 1 }

</bundles_post_ra>
